<compile_context>
chip_gen: v7x
topology: tpu7x:2x2x1
jax: 0.10.0
libtpu: 0.0.40
codegen_flags: <defaults>
</compile_context>

<pallas_src>
import functools

import jax
import jax.numpy as jnp
from jax import lax
from jax.experimental import pallas as pl
from jax.experimental.pallas import tpu as pltpu


# --------------------------------------------------------------------------------------
# Kernel 1: CRF.forward  (emission linear layer + transition broadcast)
# --------------------------------------------------------------------------------------
def _crf_scores_kernel(feats_ref, w_ref, b_ref, trans_ref, out_ref):
    B, T, H = feats_ref.shape
    K = w_ref.shape[1]
    f2d = feats_ref[...].reshape(B * T, H)                    # leading-dim merge: layout-trivial
    emis = jnp.dot(f2d, w_ref[...],
                   preferred_element_type=jnp.float32) + b_ref[...]        # (B*T, K)
    crf = emis[:, None, :] + trans_ref[...][None, :, :]       # (B*T, K_from, K_to)
    out_ref[...] = crf.reshape(B, T, K, K)


def crf_scores_pallas(feats, emission_w, emission_b, transition):
    B, T, H = feats.shape
    K = emission_w.shape[1]
    return pl.pallas_call(
        _crf_scores_kernel,
        out_shape=jax.ShapeDtypeStruct((B, T, K, K), jnp.float32),
    )(feats.astype(jnp.float32),
      emission_w.astype(jnp.float32),
      emission_b.reshape(1, K).astype(jnp.float32),
      transition.astype(jnp.float32))


# --------------------------------------------------------------------------------------
# Kernel 2: CRF forward-algorithm (Viterbi) loss — single invocation, unrolled time loop
# --------------------------------------------------------------------------------------
def _viterbi_kernel(bst_ref,      # SMEM (T,) int32 : batch_size_t = #{lengths > t} (scalar prefetch)
                    scores_ref,   # VMEM (B, T, K, K) f32 : native [b, t, from, to] layout
                    tgt_ref,      # VMEM (B, T) int32 : flattened gold index (from*K+to); -1 = pad
                    loss_ref,     # out  (1, 1) f32
                    *, start_tag, end_tag):
    B, T, K, _ = scores_ref.shape

    # ---- constants hoisted out of the time loop (JAX does not CSE broadcast_in_dim) ----
    iota_from = lax.broadcasted_iota(jnp.int32, (B, K, K), 1)   # "from"-tag index (sublane axis)
    iota_to   = lax.broadcasted_iota(jnp.int32, (B, K, K), 2)   # "to"-tag index  (lane axis)
    flat_idx  = iota_from * K + iota_to                         # matches torch .view(B, T, K*K)
    row_b1k   = lax.broadcasted_iota(jnp.int32, (B, 1, K), 0)   # batch-row index (prefix mask)
    col_b1k   = lax.broadcasted_iota(jnp.int32, (B, 1, K), 2)   # to-tag index (end-tag pick)

    tgt_all = tgt_ref[...]                                      # (B, T)

    alpha = jnp.zeros((B, 1, K), jnp.float32)   # forward log-scores; tag index on the lane axis
    gold  = jnp.zeros((B, K, K), jnp.float32)   # accumulates the one-hot gold-path picks

    for t in range(T):                          # fully unrolled: no per-step grid/DMA overhead
        st = scores_ref[:, t, :, :]             # (B, K_from, K_to), native layout

        # gold-path score at step t (padding steps carry target -1 and never match).
        tgt_t = tgt_all[:, t:t + 1][:, None, :]                 # (B, 1, 1)
        gold = gold + jnp.where(flat_idx == tgt_t, st, 0.0)

        active = row_b1k < bst_ref[t]           # rows with length > t (lengths sorted descending)

        if t == 0:
            # alpha[b, j] = scores[b, 0, start_tag, j]
            init = jnp.sum(jnp.where(iota_from == start_tag, st, 0.0),
                           axis=1, keepdims=True)               # (B, 1, K)
            alpha = jnp.where(active, init, alpha)
        else:
            # alpha_new[b, j] = logsumexp_i( st[b, i, j] + alpha[b, i] ), computed as a
            # max-factored log-matmul-exp: the contraction over the "from" (sublane) axis runs
            # on the MXU, so neither `scores` nor `alpha` ever needs a transpose / relayout.
            s_max = jnp.max(st, axis=1, keepdims=True)          # (B, 1, K_to)
            p     = jnp.exp(st - s_max)                         # (B, K_from, K_to)
            a_max = jnp.max(alpha, axis=2, keepdims=True)       # (B, 1, 1)
            ea    = jnp.exp(alpha - a_max)                      # (B, 1, K_from)
            z = jnp.einsum('bik,bkj->bij', ea, p,
                           preferred_element_type=jnp.float32)  # (B, 1, K_to)
            # TODO(synk): log(z) becomes NaN if an entire "from" column is -inf (impossible-
            # transition masking); scores are always finite in this module, so not exercised.
            lse = a_max + s_max + jnp.log(z)                    # (B, 1, K_to)
            alpha = jnp.where(active, lse, alpha)

    all_paths = jnp.sum(jnp.where(col_b1k == end_tag, alpha, 0.0))
    loss_ref[0, 0] = (all_paths - jnp.sum(gold)) / B


def viterbi_loss_pallas(scores, targets, lengths, *, start_tag, end_tag):
    B, T, K, K2 = scores.shape
    assert K == K2
    scores = scores.astype(jnp.float32)
    targets = targets.astype(jnp.int32)
    lengths = lengths.astype(jnp.int32)

    # NOTE: like the PyTorch reference, the prefix-active update rule assumes `lengths` is
    # sorted in descending order (asserted on concrete inputs in __main__).
    t_iota = jnp.arange(T, dtype=jnp.int32)
    bst = jnp.sum(lengths[None, :] > t_iota[:, None], axis=1).astype(jnp.int32)   # (T,)
    # Fold the `t < length[b]` gold-gather validity mask into targets: -1 never matches.
    tgt_masked = jnp.where(t_iota[None, :] < lengths[:, None], targets, -1)       # (B, T)

    kernel = functools.partial(_viterbi_kernel, start_tag=start_tag, end_tag=end_tag)

    grid_spec = pltpu.PrefetchScalarGridSpec(
        num_scalar_prefetch=1,            # bst -> SMEM, read as per-step scalars
        grid=(1,),                        # single invocation: whole problem fits in VMEM
        in_specs=[
            pl.BlockSpec((B, T, K, K), lambda i, bst_ref: (0, 0, 0, 0)),
            pl.BlockSpec((B, T), lambda i, bst_ref: (0, 0)),
        ],
        out_specs=pl.BlockSpec((1, 1), lambda i, bst_ref: (0, 0)),
    )

    out = pl.pallas_call(
        kernel,
        out_shape=jax.ShapeDtypeStruct((1, 1), jnp.float32),
        grid_spec=grid_spec,
        compiler_params=pltpu.CompilerParams(dimension_semantics=("arbitrary",)),
    )(bst, scores, tgt_masked)
    return out[0, 0]


# --------------------------------------------------------------------------------------
# Pure-JAX references
# --------------------------------------------------------------------------------------
def crf_scores_ref(feats, w, b, trans):
    emis = jnp.einsum('bth,hk->btk', feats, w) + b                 # (B, T, K)
    return emis[:, :, None, :] + trans[None, None, :, :]           # (B, T, K_from, K_to)


def viterbi_loss_ref(scores, targets, lengths, start_tag, end_tag):
    B, T, K, _ = scores.shape
    flat = scores.reshape(B, T, K * K)
    gathered = jnp.take_along_axis(flat, targets[..., None], axis=2)[..., 0]    # (B, T)
    mask = jnp.arange(T)[None, :] < lengths[:, None]
    gold = jnp.sum(jnp.where(mask, gathered, 0.0))

    alpha = jnp.zeros((B, K), jnp.float32)
    for t in range(T):
        bst = jnp.sum(lengths > t)
        active = (jnp.arange(B) < bst)[:, None]
        if t == 0:
            new = scores[:, 0, start_tag, :]
        else:
            new = jax.nn.logsumexp(scores[:, t, :, :] + alpha[:, :, None], axis=1)
        alpha = jnp.where(active, new, alpha)
    return (jnp.sum(alpha[:, end_tag]) - gold) / B


if __name__ == "__main__":
    # Deterministic synthetic setup: 8 tags (incl. <start>/<end>/<pad>), small shapes.
    tag_map = {"O": 0, "B-A": 1, "I-A": 2, "B-B": 3, "I-B": 4,
               "<start>": 5, "<end>": 6, "<pad>": 7}
    K = len(tag_map)
    start_tag, end_tag = tag_map["<start>"], tag_map["<end>"]

    B, T, H = 4, 8, 32    # batch, word_pad_len, word BLSTM output width (word_rnn_dim)
    key = jax.random.PRNGKey(0)
    kf, kw, kb, ktr, kt = jax.random.split(key, 5)
    feats = jax.random.normal(kf, (B, T, H), dtype=jnp.float32)           # stand-in for BLSTM output
    emission_w = 0.1 * jax.random.normal(kw, (H, K), dtype=jnp.float32)
    emission_b = 0.1 * jax.random.normal(kb, (K,), dtype=jnp.float32)
    transition = 0.1 * jax.random.normal(ktr, (K, K), dtype=jnp.float32)  # zero-init in module; random here
    targets = jax.random.randint(kt, (B, T), 0, K * K, dtype=jnp.int32)   # flattened from*K+to gold indices
    lengths = jnp.array([8, 6, 5, 3], dtype=jnp.int32)                    # sorted descending, as the module assumes
    assert bool(jnp.all(lengths[:-1] >= lengths[1:])), "lengths must be sorted descending"

    # 1) CRF scoring head (CRF.forward) as a Pallas kernel.
    crf_scores = jax.block_until_ready(
        crf_scores_pallas(feats, emission_w, emission_b, transition))
    crf_ref = crf_scores_ref(feats, emission_w, emission_b, transition)
    assert bool(jnp.allclose(crf_scores, crf_ref, atol=1e-2, rtol=1e-2)), "CRF scores mismatch"

    # 2) CRF forward-algorithm (Viterbi) loss over those scores as a Pallas kernel.
    loss = jax.block_until_ready(
        viterbi_loss_pallas(crf_scores, targets, lengths,
                            start_tag=start_tag, end_tag=end_tag))
    ref = viterbi_loss_ref(crf_scores, targets, lengths, start_tag, end_tag)
    assert bool(jnp.isfinite(loss)), "loss is not finite"
    assert abs(float(loss) - float(ref)) < 5e-2 + 5e-3 * abs(float(ref)), \
        f"mismatch: pallas={float(loss)} ref={float(ref)}"
    print("KERNEL_OK")
</pallas_src>

<mosaic_0001>
module attributes {stable_mosaic.version = 11 : i64} {
  func.func @_crf_scores_kernel(%arg0: memref<4x8x32xf32, #tpu.memory_space<vmem>>, %arg1: memref<32x8xf32, #tpu.memory_space<vmem>>, %arg2: memref<1x8xf32, #tpu.memory_space<vmem>>, %arg3: memref<8x8xf32, #tpu.memory_space<vmem>>, %arg4: memref<4x8x8x8xf32, #tpu.memory_space<vmem>>) attributes {dimension_semantics = [], scalar_prefetch = 0 : i64, scratch_operands = 0 : i64, tpu.core_type = #tpu.core_type<tc>} {
    %c0 = arith.constant 0 : index
    %c0_0 = arith.constant 0 : index
    %c0_1 = arith.constant 0 : index
    %0 = vector.load %arg0[%c0, %c0_0, %c0_1] : memref<4x8x32xf32, #tpu.memory_space<vmem>>, vector<4x8x32xf32>
    %1 = vector.shape_cast %0 : vector<4x8x32xf32> to vector<32x32xf32>
    %c0_2 = arith.constant 0 : index
    %c0_3 = arith.constant 0 : index
    %2 = vector.load %arg1[%c0_2, %c0_3] : memref<32x8xf32, #tpu.memory_space<vmem>>, vector<32x8xf32>
    %cst = arith.constant dense<0.000000e+00> : vector<32x8xf32>
    %3 = tpu.matmul %1, %2, %cst {dimension_numbers = #tpu.dot_dimension_numbers<[1], [0], [0], [1], [0, 0, 1, 1], [], []>} : vector<32x32xf32>, vector<32x8xf32>, vector<32x8xf32> -> vector<32x8xf32>
    %c0_4 = arith.constant 0 : index
    %c0_5 = arith.constant 0 : index
    %4 = vector.load %arg2[%c0_4, %c0_5] : memref<1x8xf32, #tpu.memory_space<vmem>>, vector<1x8xf32>
    %5 = vector.broadcast %4 : vector<1x8xf32> to vector<32x8xf32>
    %6 = arith.addf %3, %5 : vector<32x8xf32>
    %7 = vector.shape_cast %6 : vector<32x8xf32> to vector<32x1x8xf32>
    %c0_6 = arith.constant 0 : index
    %c0_7 = arith.constant 0 : index
    %8 = vector.load %arg3[%c0_6, %c0_7] : memref<8x8xf32, #tpu.memory_space<vmem>>, vector<8x8xf32>
    %9 = vector.shape_cast %8 : vector<8x8xf32> to vector<1x8x8xf32>
    %10 = vector.broadcast %7 : vector<32x1x8xf32> to vector<32x8x8xf32>
    %11 = vector.broadcast %9 : vector<1x8x8xf32> to vector<32x8x8xf32>
    %12 = arith.addf %10, %11 : vector<32x8x8xf32>
    %13 = vector.shape_cast %12 : vector<32x8x8xf32> to vector<4x8x8x8xf32>
    %c0_8 = arith.constant 0 : index
    %c0_9 = arith.constant 0 : index
    %c0_10 = arith.constant 0 : index
    %c0_11 = arith.constant 0 : index
    %14 = vector.load %arg4[%c0_8, %c0_9, %c0_10, %c0_11] : memref<4x8x8x8xf32, #tpu.memory_space<vmem>>, vector<4x8x8x8xf32>
    tpu.vector_store %arg4[%c0_8, %c0_9, %c0_10, %c0_11], %13 {strides = array<i32>} : memref<4x8x8x8xf32, #tpu.memory_space<vmem>>, vector<4x8x8x8xf32>,
    return
  }
}

</mosaic_0001>

<bundles_post_ra>
// kernel: tpu_custom_call.1
= control target key start
LH: loop header
LB: loop body
LE: loop exit
PB: predicated region body
PF: predicated region fallthrough
CT: control target
= control target key end

     0   :  { %vm33_vm0 = vcmask 261120   ;;  %s867_s0 = inlined_call_operand.vmem [shape: f32[4,8,32], index: 0, kind: input, shape index: {}]   ;;  %s868_s1 = inlined_call_operand.vmem [shape: f32[32,8], index: 1, kind: input, shape index: {}]   ;;  %s869_s2 = inlined_call_operand.vmem [shape: f32[1,8], index: 2, kind: input, shape index: {}]   ;;  %s870_s3 = inlined_call_operand.vmem [shape: f32[8,8], index: 3, kind: input, shape index: {}]   ;;  %s871_s4 = inlined_call_operand.hbm [shape: f32[4,8,8,8], index: 4, kind: output, shape index: {}]  }
   0x1   :  { %v22_v0 = vld [vmem:[%s868_s1] sm:$0xff]  ;;  %v23_v1 = vld [vmem:[%s868_s1 + $0x8] sm:$0xff]  ;;  %v24_v2 = vld [vmem:[%s868_s1 + $0x10] sm:$0xff] }
   0x2   :  { %v600_v3 = vpack.c.bf16 %v23_v1, %v22_v0  ;;  %v25_v4 = vld [vmem:[%s868_s1 + $0x18] sm:$0xff]  ;;  %v18_v5 = vld [vmem:[%s867_s0] sm:$0xff]  ;;  %v20_v6 = vld [vmem:[%s867_s0 + $0x10] sm:$0xff] }
   0x3   :  { %v604_v7 = vpack.c.bf16 %v25_v4, %v24_v2  ;;  %594 = vmatprep.mubr.msk.f32.mxu0 %vm33_vm0, %v18_v5  ;;  %597 = vmatprep.mubr.msk.f32.mxu1 %vm33_vm0, %v20_v6 }
   0x4   :  { %9 = vsyncpa [#allocation3], 0  ;;  %601 = vmatprep.subr.bf16.mxu0 %v600_v3  ;;  %608 = vmatprep.subr.bf16.mxu1 %v600_v3  ;;  %v19_v8 = vld [vmem:[%s867_s0 + $0x8] sm:$0xff]  ;;  %v21_v9 = vld [vmem:[%s867_s0 + $0x18] sm:$0xff]  ;;  %v640_v10 = vmov 1966171168   ;;  %v139_v12 = vlaneseq }
   0x5   :  { %603 = vmatpush3.bf16.msra.mxu0 %v600_v3  ;;  %610 = vmatpush3.bf16.msra.mxu1 %v600_v3  ;;  %v137_v11 = vunpack.c.l.s4 %v640_v10  ;;  %v573_v15 = vld [vmem:[%s869_s2] ss:$0 sm:$0xff]  ;;  %vm524_vm1 = vcmask 64512  }
   0x6   :  { %605 = vmatprep.subr.bf16.mxu0 %v604_v7  ;;  %609 = vmatprep.subr.bf16.mxu1 %v604_v7  ;;  %v140_v14 = vshrl.u32 %v139_v12, 7  ;;  %v731_v46 = vld [vmem:[%s870_s3] sm:$0xff]  ;;  %s641_s3 = smov [#allocation2]  }
   0x7   :  { %v138_v13 = vunpack.c.0.s8 %v137_v11  ;;  %s562_s6 = sshll.u32 %s641_s3, 4  ;;  %s563_s6 = int_to_ptr.vmem [resolvable:$true] %s562_s6 }
   0x8   :  { %v702_v23 = vsub.s32 0, %v140_v14  ;;  %s616_s7 = scalar_lea.vmem %s563_s6, 4096  ;;  %p621_p1 = scmp.lt.s32.totalorder %s563_s6, %s563_s6 }
   0x9   :  { %607 = vmatpush3.bf16.msra.mxu0 %v604_v7  ;;  %611 = vmatpush3.bf16.msra.mxu1 %v604_v7  ;;  %v700_v16 = vsub.s32 %v138_v13, %v140_v14  ;;  %p617_p0 = scmp.ne.s32.totalorder %s563_s6, %s616_s7  ;;  %p622_p2 = scmp.lt.s32.totalorder %s616_s7, %s616_s7 }
   0xb   :  { %p623_p3 = por %p622_p2, %p621_p1 }
   0xc   :  { %595 = vmatmul.mubr.msk.f32.vlgmr.msra.gmra.mrb[0].mxu0 %vm33_vm0, %v19_v8  ;;  %598 = vmatmul.mubr.msk.f32.vlgmr.msra.gmra.mrb[0].mxu1 %vm33_vm0, %v21_v9 }
   0xd   :  { %p624_p4 = pnand %p623_p3, %p617_p0 }
  0xdf   :  { %v596_v17 = vpop.f32.mrb[0].mxu0  ;;  %v599_v18 = vpop.f32.mrb[0].mxu1 }
  0xe0   :  { %v118_v19 = vadd.f32 %v596_v17, %v573_v15  ;;  %v128_v20 = vadd.f32 %v599_v18, %v573_v15  ;;  %v112_v21 = vpop.f32.mrb[1].mxu0  ;;  %v122_v22 = vpop.f32.mrb[1].mxu1 }
  0xe1   :  { %v113_v24 = vadd.f32 %v573_v15, %v112_v21  ;;  %v704_v25 = vadd.f32 %v573_v15, %v122_v22 }
  0xe2   :  { %v184_v26 = vcombine.high %v118_v19, %v118_v19  ;;  %v191_v27 = vrot.slane %v118_v19, %v700_v16  ;;  %v282_v28 = vcombine.high %v128_v20, %v128_v20  ;;  %v289_v29 = vrot.slane %v128_v20, %v700_v16 }
  0xe3   :  { %v135_v30 = vcombine.high %v113_v24, %v113_v24  ;;  %v709_v31 = vrot.slane %v113_v24, %v700_v16  ;;  %v233_v32 = vcombine.high %v704_v25, %v704_v25  ;;  %v715_v33 = vrot.slane %v704_v25, %v700_v16 }
  0xe4   :  { %v198_v34 = vrot.slane %v184_v26, %v700_v16  ;;  %v199_v35 = vcombine.high %v191_v27, %v191_v27  ;;  %v207_v36 = vrot.slane %v191_v27, %v700_v16  ;;  %v296_v37 = vrot.slane %v282_v28, %v700_v16 }
  0xe5   :  { %v297_v38 = vcombine.high %v289_v29, %v289_v29  ;;  %v305_v39 = vrot.slane %v289_v29, %v700_v16  ;;  %v722_v40 = vrot.slane %v135_v30, %v700_v16  ;;  %v150_v41 = vcombine.high %v709_v31, %v709_v31 }
  0xe6   :  { %v200_v42 = vcombine.high %v198_v34, %v198_v34  ;;  %v214_v43 = vrot.slane %v198_v34, %v700_v16  ;;  %v221_v44 = vrot.slane %v199_v35, %v700_v16  ;;  %v229_v45 = vcombine.high %v207_v36, %v207_v36 }
  0xe7   :  { %v367_v47 = vrot.slane %v207_v36, %v702_v23  ;;  %v298_v48 = vcombine.high %v296_v37, %v296_v37  ;;  %v312_v49 = vrot.slane %v296_v37, %v700_v16  ;;  %v319_v50 = vrot.slane %v297_v38, %v700_v16 }
  0xe8   :  { %v228_v51 = vrot.slane %v200_v42, %v700_v16  ;;  %v230_v52 = vcombine.high %v214_v43, %v214_v43  ;;  %v231_v53 = vcombine.high %v221_v44, %v221_v44  ;;  %v371_v54 = vrot.slane %v221_v44, %v702_v23 }
  0xe9   :  { %v375_v55 = vrot.slane %v229_v45, %v702_v23  ;;  %v383_v56 = vrot.slane %v214_v43, %v702_v23  ;;  %v500_v57 = vadd.f32 %v367_v47, %v731_v46  ;;  %v326_v58 = vrot.slane %v298_v48, %v700_v16 }
  0xea   :  { %v232_v59 = vcombine.high %v228_v51, %v228_v51  ;;  %v379_v60 = vrot.slane %v231_v53, %v702_v23  ;;  %v387_v61 = vrot.slane %v228_v51, %v702_v23  ;;  %v391_v62 = vrot.slane %v230_v52, %v702_v23 }
  0xeb   :  { %v501_v63 = vadd.f32 %v371_v54, %v731_v46  ;;  %v502_v0 = vadd.f32 %v375_v55, %v731_v46  ;;  %v504_v1 = vadd.f32 %v383_v56, %v731_v46  ;;  %533 = vst.msk [vmem:[#allocation2 + $0x40] sm:$0xff] %vm524_vm1, %v500_v57  ;;  %v327_v2 = vcombine.high %v305_v39, %v305_v39 }
  0xec   :  { %v395_v3 = vrot.slane %v232_v59, %v702_v23  ;;  %v503_v4 = vadd.f32 %v379_v60, %v731_v46  ;;  %v505_v5 = vadd.f32 %v387_v61, %v731_v46  ;;  %v506_v6 = vadd.f32 %v391_v62, %v731_v46 }
  0xed   :  { %534 = vst.msk [vmem:[#allocation2 + $0x48] sm:$0xff] %vm524_vm1, %v501_v63  ;;  %535 = vst.msk [vmem:[#allocation2 + $0x50] sm:$0xff] %vm524_vm1, %v502_v0  ;;  %v328_v7 = vcombine.high %v312_v49, %v312_v49  ;;  %v329_v8 = vcombine.high %v319_v50, %v319_v50  ;;  %v330_v9 = vcombine.high %v326_v58, %v326_v58 }
  0xee   :  { %537 = vst.msk [vmem:[#allocation2 + $0x60] sm:$0xff] %vm524_vm1, %v504_v1  ;;  %v431_v10 = vrot.slane %v305_v39, %v702_v23  ;;  %v507_v11 = vadd.f32 %v395_v3, %v731_v46  ;;  %536 = vst.msk [vmem:[#allocation2 + $0x58] sm:$0xff] %vm524_vm1, %v503_v4  ;;  %v435_v12 = vrot.slane %v319_v50, %v702_v23 }
  0xef   :  { %538 = vst.msk [vmem:[#allocation2 + $0x68] sm:$0xff] %vm524_vm1, %v505_v5  ;;  %539 = vst.msk [vmem:[#allocation2 + $0x70] sm:$0xff] %vm524_vm1, %v506_v6  ;;  %v439_v13 = vrot.slane %v327_v2, %v702_v23  ;;  %v447_v14 = vrot.slane %v312_v49, %v702_v23  ;;  %v443_v15 = vrot.slane %v329_v8, %v702_v23 }
  0xf0   :  { %v451_v17 = vrot.slane %v326_v58, %v702_v23  ;;  %v455_v18 = vrot.slane %v328_v7, %v702_v23  ;;  %v459_v19 = vrot.slane %v330_v9, %v702_v23  ;;  %540 = vst.msk [vmem:[#allocation2 + $0x78] sm:$0xff] %vm524_vm1, %v507_v11  ;;  %v516_v20 = vadd.f32 %v431_v10, %v731_v46 }
  0xf1   :  { %v517_v21 = vadd.f32 %v435_v12, %v731_v46  ;;  %v518_v22 = vadd.f32 %v439_v13, %v731_v46  ;;  %v520_v24 = vadd.f32 %v447_v14, %v731_v46  ;;  %v519_v26 = vadd.f32 %v443_v15, %v731_v46 }
  0xf2   :  { %v521_v27 = vadd.f32 %v451_v17, %v731_v46  ;;  %v522_v28 = vadd.f32 %v455_v18, %v731_v46  ;;  %v523_v29 = vadd.f32 %v459_v19, %v731_v46  ;;  %549 = vst.msk [vmem:[#allocation2 + $0xc0] sm:$0xff] %vm524_vm1, %v516_v20  ;;  %v151_v30 = vcombine.high %v722_v40, %v722_v40 }
  0xf3   :  { %550 = vst.msk [vmem:[#allocation2 + $0xc8] sm:$0xff] %vm524_vm1, %v517_v21  ;;  %551 = vst.msk [vmem:[#allocation2 + $0xd0] sm:$0xff] %vm524_vm1, %v518_v22  ;;  %v158_v34 = vrot.slane %v709_v31, %v700_v16  ;;  %v165_v35 = vrot.slane %v722_v40, %v700_v16  ;;  %v172_v36 = vrot.slane %v150_v41, %v700_v16 }
  0xf4   :  { %553 = vst.msk [vmem:[#allocation2 + $0xe0] sm:$0xff] %vm524_vm1, %v520_v24  ;;  %552 = vst.msk [vmem:[#allocation2 + $0xd8] sm:$0xff] %vm524_vm1, %v519_v26  ;;  %v247_v37 = vrot.slane %v233_v32, %v700_v16  ;;  %v248_v38 = vcombine.high %v715_v33, %v715_v33  ;;  %v256_v31 = vrot.slane %v715_v33, %v700_v16 }
  0xf5   :  { %554 = vst.msk [vmem:[#allocation2 + $0xe8] sm:$0xff] %vm524_vm1, %v521_v27  ;;  %555 = vst.msk [vmem:[#allocation2 + $0xf0] sm:$0xff] %vm524_vm1, %v522_v28  ;;  %v179_v39 = vrot.slane %v151_v30, %v700_v16  ;;  %v180_v40 = vcombine.high %v158_v34, %v158_v34  ;;  %v181_v41 = vcombine.high %v165_v35, %v165_v35 }
  0xf6   :  { %556 = vst.msk [vmem:[#allocation2 + $0xf8] sm:$0xff] %vm524_vm1, %v523_v29  ;;  %v182_v42 = vcombine.high %v172_v36, %v172_v36  ;;  %v335_v43 = vrot.slane %v158_v34, %v702_v23  ;;  %v339_v44 = vrot.slane %v172_v36, %v702_v23  ;;  %v351_v45 = vrot.slane %v165_v35, %v702_v23 }
  0xf7   :  { %v249_v47 = vcombine.high %v247_v37, %v247_v37  ;;  %v183_v25 = vcombine.high %v179_v39, %v179_v39  ;;  %v343_v32 = vrot.slane %v180_v40, %v702_v23  ;;  %v355_v49 = vrot.slane %v179_v39, %v702_v23 }
  0xf8   :  { %v347_v48 = vrot.slane %v182_v42, %v702_v23  ;;  %v359_v33 = vrot.slane %v181_v41, %v702_v23  ;;  %v492_v50 = vadd.f32 %v335_v43, %v731_v46  ;;  %v493_v51 = vadd.f32 %v339_v44, %v731_v46 }
  0xf9   :  { %v496_v52 = vadd.f32 %v351_v45, %v731_v46  ;;  %v363_v53 = vrot.slane %v183_v25, %v702_v23  ;;  %v494_v54 = vadd.f32 %v343_v32, %v731_v46  ;;  %v497_v56 = vadd.f32 %v355_v49, %v731_v46 }
  0xfa   :  { %v495_v55 = vadd.f32 %v347_v48, %v731_v46  ;;  %v498_v57 = vadd.f32 %v359_v33, %v731_v46  ;;  %525 = vst.msk [vmem:[#allocation2] sm:$0xff] %vm524_vm1, %v492_v50  ;;  %526 = vst.msk [vmem:[#allocation2 + $0x8] sm:$0xff] %vm524_vm1, %v493_v51  ;;  %v263_v58 = vrot.slane %v247_v37, %v700_v16 }
  0xfb   :  { %529 = vst.msk [vmem:[#allocation2 + $0x20] sm:$0xff] %vm524_vm1, %v496_v52  ;;  %v270_v59 = vrot.slane %v248_v38, %v700_v16  ;;  %v277_v60 = vrot.slane %v249_v47, %v700_v16  ;;  %v499_v61 = vadd.f32 %v363_v53, %v731_v46  ;;  %527 = vst.msk [vmem:[#allocation2 + $0x10] sm:$0xff] %vm524_vm1, %v494_v54 }
  0xfc   :  { %528 = vst.msk [vmem:[#allocation2 + $0x18] sm:$0xff] %vm524_vm1, %v495_v55  ;;  %530 = vst.msk [vmem:[#allocation2 + $0x28] sm:$0xff] %vm524_vm1, %v497_v56  ;;  %v278_v62 = vcombine.high %v256_v31, %v256_v31  ;;  %v399_v63 = vrot.slane %v256_v31, %v702_v23  ;;  %v279_v0 = vcombine.high %v263_v58, %v263_v58 }
  0xfd   :  { %531 = vst.msk [vmem:[#allocation2 + $0x30] sm:$0xff] %vm524_vm1, %v498_v57  ;;  %v280_v1 = vcombine.high %v270_v59, %v270_v59  ;;  %v281_v2 = vcombine.high %v277_v60, %v277_v60  ;;  %v403_v3 = vrot.slane %v270_v59, %v702_v23  ;;  %532 = vst.msk [vmem:[#allocation2 + $0x38] sm:$0xff] %vm524_vm1, %v499_v61 }
  0xfe   :  { %v407_v16 = vrot.slane %v278_v62, %v702_v23  ;;  %v415_v4 = vrot.slane %v263_v58, %v702_v23  ;;  %v419_v5 = vrot.slane %v277_v60, %v702_v23  ;;  %v508_v6 = vadd.f32 %v399_v63, %v731_v46 }
  0xff   :  { %v411_v7 = vrot.slane %v280_v1, %v702_v23  ;;  %v423_v8 = vrot.slane %v279_v0, %v702_v23  ;;  %v427_v9 = vrot.slane %v281_v2, %v702_v23  ;;  %v509_v10 = vadd.f32 %v403_v3, %v731_v46 }
 0x100   :  { %v510_v11 = vadd.f32 %v407_v16, %v731_v46  ;;  %v512_v12 = vadd.f32 %v415_v4, %v731_v46  ;;  %v513_v13 = vadd.f32 %v419_v5, %v731_v46  ;;  %541 = vst.msk [vmem:[#allocation2 + $0x80] sm:$0xff] %vm524_vm1, %v508_v6 }
 0x101   :  { %v511_v14 = vadd.f32 %v411_v7, %v731_v46  ;;  %v514_v15 = vadd.f32 %v423_v8, %v731_v46  ;;  %v515_v17 = vadd.f32 %v427_v9, %v731_v46  ;;  %542 = vst.msk [vmem:[#allocation2 + $0x88] sm:$0xff] %vm524_vm1, %v509_v10 }
 0x102   :  { %543 = vst.msk [vmem:[#allocation2 + $0x90] sm:$0xff] %vm524_vm1, %v510_v11  ;;  %545 = vst.msk [vmem:[#allocation2 + $0xa0] sm:$0xff] %vm524_vm1, %v512_v12 }
 0x103   :  { %546 = vst.msk [vmem:[#allocation2 + $0xa8] sm:$0xff] %vm524_vm1, %v513_v13  ;;  %544 = vst.msk [vmem:[#allocation2 + $0x98] sm:$0xff] %vm524_vm1, %v511_v14 }
 0x104   :  { %547 = vst.msk [vmem:[#allocation2 + $0xb0] sm:$0xff] %vm524_vm1, %v514_v15  ;;  %548 = vst.msk [vmem:[#allocation2 + $0xb8] sm:$0xff] %vm524_vm1, %v515_v17 }
 0x105   :  { %627 = shalt.err (!%p624_p4)
}
 0x106   :  { %s628_s10 = scalar_lea.hbm %s871_s4, 4096 }
 0x107   :  { %p629_p5 = scmp.ne.s32.totalorder %s871_s4, %s628_s10  ;;  %p632_p6 = scmp.lt.u32.totalorder %s628_s10, %s871_s4 }
 0x109   :  { %p634_p7 = pnand %p632_p6, %p629_p5 }
 0x10b   :  { %637 = shalt.err (!%p634_p7)
}
 0x10c   :  { %s642_s15 = smov 128   ;;  %s643_s16 = smov 8  }
 0x10d   :  { %568 = dma.vmem_to_hbm [thread:$0]  %s563_s6, 4096, %s871_s4, [#allocation3], %s642_s15, %s642_s15, %s643_s16  }
 0x10e   :  { %638 = dma.done.wait [#allocation3], 4096  }
 0x10f   :  { %639 = vsyncadd [#allocation3], 4294963200 }
 0x110   :  { %572 = vsyncpa [#allocation3], 1 }

</bundles_post_ra>
